<compile_context>
chip_gen: v7x
topology: tpu7x:2x2x1
jax: 0.10.0
libtpu: 0.0.40
codegen_flags: <defaults>
</compile_context>

<pallas_src>
import jax
import jax.numpy as jnp
from jax import lax
from jax.experimental import pallas as pl
from jax.experimental.pallas import tpu as pltpu


def _sobel_kernel(x_ref, gx_ref, gy_ref):
    """Separable Sobel on one (K, H, W) block; zero-padding via masked rolls."""
    x = x_ref[...]                      # (K, H, W) f32
    K, H, W = x.shape

    lane = lax.broadcasted_iota(jnp.int32, (K, H, W), 2)   # column index (lane axis)
    row = lax.broadcasted_iota(jnp.int32, (K, H, W), 1)    # row index (sublane axis)

    # Lane (W-axis) neighbours with zero fill at the borders.
    # roll by W-1 along lanes == shift by -1 (brings x[..., j+1] to position j).
    x_r = jnp.where(lane == W - 1, 0.0, pltpu.roll(x, W - 1, 2))   # x[:, :, j+1]
    x_l = jnp.where(lane == 0, 0.0, pltpu.roll(x, 1, 2))           # x[:, :, j-1]

    d = x_r - x_l                 # horizontal central difference  [-1, 0, 1]
    s = x_r + 2.0 * x + x_l       # horizontal smoothing           [ 1, 2, 1]

    # Sublane (H-axis) neighbours with zero fill at the borders.
    d_up = jnp.where(row == 0, 0.0, pltpu.roll(d, 1, 1))           # d[i-1]
    d_dn = jnp.where(row == H - 1, 0.0, pltpu.roll(d, H - 1, 1))   # d[i+1]
    s_up = jnp.where(row == 0, 0.0, pltpu.roll(s, 1, 1))           # s[i-1]
    s_dn = jnp.where(row == H - 1, 0.0, pltpu.roll(s, H - 1, 1))   # s[i+1]

    # kernel_x = [1,2,1]^T (rows) x [-1,0,1] (cols)
    # kernel_y = [-1,0,1]^T (rows) x [1,2,1] (cols)
    gx_ref[...] = jnp.abs(d_up + 2.0 * d + d_dn)
    gy_ref[...] = jnp.abs(s_dn - s_up)


def _planes_per_step(nc, h, w, budget_bytes=2 << 20):
    """Largest divisor of nc whose block fits the VMEM budget.

    Prefers keeping >= 2 grid steps (v7x megacore sharding). Budget is kept
    modest (~2 MiB input block -> ~10-20 MiB total with double-buffered outs
    and temporaries), which is safe under v7x's 64 MiB VMEM as well.
    """
    plane_bytes = h * w * 4
    max_k = max(1, budget_bytes // plane_bytes)
    divisors = [k for k in range(1, nc + 1) if nc % k == 0 and k <= max_k]
    preferred = [k for k in divisors if nc // k >= 2]
    return max(preferred) if preferred else max(divisors)


def gradient_net(x):
    """x: (N, C, H, W) float32 with C == 1 (matches the (1,1,3,3) conv weight).

    Returns (|grad_x|, |grad_y|), each (N, C, H, W), matching
    F.conv2d(x, w, padding=1) followed by torch.abs.
    """
    N, C, H, W = x.shape
    assert C == 1, "Gradient_Net's conv weight is (1,1,3,3); requires C == 1"

    nc = N * C
    x2 = x.reshape(nc, H, W).astype(jnp.float32)

    K = _planes_per_step(nc, H, W)
    grid = (nc // K,)
    block = (K, H, W)

    # Note: gx/gy could be emitted as bf16 to halve store traffic on v5e if the
    # downstream loss tolerates it; kept f32 to match the PyTorch module.
    cost = pl.CostEstimate(
        flops=12 * nc * H * W,
        transcendentals=0,
        bytes_accessed=3 * nc * H * W * 4,   # 1 read + 2 writes, f32
    )

    gx, gy = pl.pallas_call(
        _sobel_kernel,
        out_shape=(
            jax.ShapeDtypeStruct((nc, H, W), jnp.float32),
            jax.ShapeDtypeStruct((nc, H, W), jnp.float32),
        ),
        grid=grid,
        in_specs=[pl.BlockSpec(block, lambda i: (i, 0, 0))],
        out_specs=(
            pl.BlockSpec(block, lambda i: (i, 0, 0)),
            pl.BlockSpec(block, lambda i: (i, 0, 0)),
        ),
        compiler_params=pltpu.CompilerParams(
            dimension_semantics=("parallel",)),
        cost_estimate=cost,
    )(x2)

    return gx.reshape(N, C, H, W), gy.reshape(N, C, H, W)


def _reference(x):
    # Pure-JAX reference (same cross-correlation semantics as F.conv2d).
    kx = jnp.array([[-1.0, 0.0, 1.0], [-2.0, 0.0, 2.0], [-1.0, 0.0, 1.0]],
                   jnp.float32)
    ky = jnp.array([[-1.0, -2.0, -1.0], [0.0, 0.0, 0.0], [1.0, 2.0, 1.0]],
                   jnp.float32)
    w = jnp.stack([kx, ky])[:, None]  # (2,1,3,3)
    out = lax.conv_general_dilated(
        x, w, window_strides=(1, 1), padding=((1, 1), (1, 1)),
        dimension_numbers=("NCHW", "OIHW", "NCHW"))
    return jnp.abs(out[:, 0:1]), jnp.abs(out[:, 1:2])


if __name__ == "__main__":
    key = jax.random.PRNGKey(0)
    # Module's conv weight is (1,1,3,3) -> single input channel.
    x = jax.random.normal(key, (2, 1, 16, 16), dtype=jnp.float32)

    gx, gy = gradient_net(x)
    jax.block_until_ready((gx, gy))

    rgx, rgy = _reference(x)
    assert jnp.allclose(gx, rgx, atol=1e-5), "grad_x mismatch"
    assert jnp.allclose(gy, rgy, atol=1e-5), "grad_y mismatch"

    print("KERNEL_OK")
</pallas_src>

<mosaic_0001>
module attributes {stable_mosaic.version = 11 : i64} {
  func.func @_sobel_kernel(%arg0: i32, %arg1: memref<1x16x16xf32, #tpu.memory_space<vmem>>, %arg2: memref<1x16x16xf32, #tpu.memory_space<vmem>>, %arg3: memref<1x16x16xf32, #tpu.memory_space<vmem>>) attributes {dimension_semantics = [#tpu.dimension_semantics<parallel>], iteration_bounds = array<i64: 2>, scalar_prefetch = 0 : i64, scratch_operands = 0 : i64, tpu.core_type = #tpu.core_type<tc>, window_params = [{transform_indices = @transform_0, window_bounds = array<i64: 1, 16, 16>}, {transform_indices = @transform_1, window_bounds = array<i64: 1, 16, 16>}, {transform_indices = @transform_2, window_bounds = array<i64: 1, 16, 16>}]} {
    %c0 = arith.constant 0 : index
    %c0_0 = arith.constant 0 : index
    %c0_1 = arith.constant 0 : index
    %0 = vector.load %arg1[%c0, %c0_0, %c0_1] : memref<1x16x16xf32, #tpu.memory_space<vmem>>, vector<1x16x16xf32>
    %1 = tpu.iota {dimensions = array<i32: 2>} : vector<1x16x16xi32>
    %2 = tpu.iota {dimensions = array<i32: 1>} : vector<1x16x16xi32>
    %c15_i32 = arith.constant 15 : i32
    %3 = vector.broadcast %c15_i32 : i32 to vector<1x16x16xi32>
    %4 = arith.cmpi eq, %1, %3 : vector<1x16x16xi32>
    %c15_i32_2 = arith.constant 15 : i32
    %5 = tpu.dynamic_rotate %0 by %c15_i32_2 dim 2 : vector<1x16x16xf32>, i32 -> vector<1x16x16xf32>
    %cst = arith.constant 0.000000e+00 : f32
    %6 = vector.broadcast %cst : f32 to vector<1x16x16xf32>
    %7 = arith.select %4, %6, %5 : vector<1x16x16xi1>, vector<1x16x16xf32>
    %c0_i32 = arith.constant 0 : i32
    %8 = vector.broadcast %c0_i32 : i32 to vector<1x16x16xi32>
    %9 = arith.cmpi eq, %1, %8 : vector<1x16x16xi32>
    %c1_i32 = arith.constant 1 : i32
    %10 = tpu.dynamic_rotate %0 by %c1_i32 dim 2 : vector<1x16x16xf32>, i32 -> vector<1x16x16xf32>
    %cst_3 = arith.constant 0.000000e+00 : f32
    %11 = vector.broadcast %cst_3 : f32 to vector<1x16x16xf32>
    %12 = arith.select %9, %11, %10 : vector<1x16x16xi1>, vector<1x16x16xf32>
    %13 = arith.subf %7, %12 : vector<1x16x16xf32>
    %cst_4 = arith.constant 2.000000e+00 : f32
    %14 = vector.broadcast %cst_4 : f32 to vector<1x16x16xf32>
    %15 = arith.mulf %14, %0 : vector<1x16x16xf32>
    %16 = arith.addf %7, %15 : vector<1x16x16xf32>
    %17 = arith.addf %16, %12 : vector<1x16x16xf32>
    %c0_i32_5 = arith.constant 0 : i32
    %18 = vector.broadcast %c0_i32_5 : i32 to vector<1x16x16xi32>
    %19 = arith.cmpi eq, %2, %18 : vector<1x16x16xi32>
    %c1_i32_6 = arith.constant 1 : i32
    %20 = tpu.dynamic_rotate %13 by %c1_i32_6 dim 1 : vector<1x16x16xf32>, i32 -> vector<1x16x16xf32>
    %cst_7 = arith.constant 0.000000e+00 : f32
    %21 = vector.broadcast %cst_7 : f32 to vector<1x16x16xf32>
    %22 = arith.select %19, %21, %20 : vector<1x16x16xi1>, vector<1x16x16xf32>
    %c15_i32_8 = arith.constant 15 : i32
    %23 = vector.broadcast %c15_i32_8 : i32 to vector<1x16x16xi32>
    %24 = arith.cmpi eq, %2, %23 : vector<1x16x16xi32>
    %c15_i32_9 = arith.constant 15 : i32
    %25 = tpu.dynamic_rotate %13 by %c15_i32_9 dim 1 : vector<1x16x16xf32>, i32 -> vector<1x16x16xf32>
    %cst_10 = arith.constant 0.000000e+00 : f32
    %26 = vector.broadcast %cst_10 : f32 to vector<1x16x16xf32>
    %27 = arith.select %24, %26, %25 : vector<1x16x16xi1>, vector<1x16x16xf32>
    %c0_i32_11 = arith.constant 0 : i32
    %28 = vector.broadcast %c0_i32_11 : i32 to vector<1x16x16xi32>
    %29 = arith.cmpi eq, %2, %28 : vector<1x16x16xi32>
    %c1_i32_12 = arith.constant 1 : i32
    %30 = tpu.dynamic_rotate %17 by %c1_i32_12 dim 1 : vector<1x16x16xf32>, i32 -> vector<1x16x16xf32>
    %cst_13 = arith.constant 0.000000e+00 : f32
    %31 = vector.broadcast %cst_13 : f32 to vector<1x16x16xf32>
    %32 = arith.select %29, %31, %30 : vector<1x16x16xi1>, vector<1x16x16xf32>
    %c15_i32_14 = arith.constant 15 : i32
    %33 = vector.broadcast %c15_i32_14 : i32 to vector<1x16x16xi32>
    %34 = arith.cmpi eq, %2, %33 : vector<1x16x16xi32>
    %c15_i32_15 = arith.constant 15 : i32
    %35 = tpu.dynamic_rotate %17 by %c15_i32_15 dim 1 : vector<1x16x16xf32>, i32 -> vector<1x16x16xf32>
    %cst_16 = arith.constant 0.000000e+00 : f32
    %36 = vector.broadcast %cst_16 : f32 to vector<1x16x16xf32>
    %37 = arith.select %34, %36, %35 : vector<1x16x16xi1>, vector<1x16x16xf32>
    %cst_17 = arith.constant 2.000000e+00 : f32
    %38 = vector.broadcast %cst_17 : f32 to vector<1x16x16xf32>
    %39 = arith.mulf %38, %13 : vector<1x16x16xf32>
    %40 = arith.addf %22, %39 : vector<1x16x16xf32>
    %41 = arith.addf %40, %27 : vector<1x16x16xf32>
    %42 = math.absf %41 : vector<1x16x16xf32>
    %c0_18 = arith.constant 0 : index
    %c0_19 = arith.constant 0 : index
    %c0_20 = arith.constant 0 : index
    %43 = vector.load %arg2[%c0_18, %c0_19, %c0_20] : memref<1x16x16xf32, #tpu.memory_space<vmem>>, vector<1x16x16xf32>
    tpu.vector_store %arg2[%c0_18, %c0_19, %c0_20], %42 {strides = array<i32>} : memref<1x16x16xf32, #tpu.memory_space<vmem>>, vector<1x16x16xf32>,
    %44 = arith.subf %37, %32 : vector<1x16x16xf32>
    %45 = math.absf %44 : vector<1x16x16xf32>
    %c0_21 = arith.constant 0 : index
    %c0_22 = arith.constant 0 : index
    %c0_23 = arith.constant 0 : index
    %46 = vector.load %arg3[%c0_21, %c0_22, %c0_23] : memref<1x16x16xf32, #tpu.memory_space<vmem>>, vector<1x16x16xf32>
    tpu.vector_store %arg3[%c0_21, %c0_22, %c0_23], %45 {strides = array<i32>} : memref<1x16x16xf32, #tpu.memory_space<vmem>>, vector<1x16x16xf32>,
    return
  }
  func.func @transform_0(%arg0: i32) -> (i32, i32, i32) {
    %c0_i32 = arith.constant 0 : i32
    %c0_i32_0 = arith.constant 0 : i32
    %c0_i32_1 = arith.constant 0 : i32
    return %arg0, %c0_i32, %c0_i32_0 : i32, i32, i32
  }
  func.func @transform_1(%arg0: i32) -> (i32, i32, i32) {
    %c0_i32 = arith.constant 0 : i32
    %c0_i32_0 = arith.constant 0 : i32
    %c0_i32_1 = arith.constant 0 : i32
    return %arg0, %c0_i32, %c0_i32_0 : i32, i32, i32
  }
  func.func @transform_2(%arg0: i32) -> (i32, i32, i32) {
    %c0_i32 = arith.constant 0 : i32
    %c0_i32_0 = arith.constant 0 : i32
    %c0_i32_1 = arith.constant 0 : i32
    return %arg0, %c0_i32, %c0_i32_0 : i32, i32, i32
  }
}

</mosaic_0001>

<bundles_post_ra>
// kernel: tpu_custom_call.1
= control target key start
LH: loop header
LB: loop body
LE: loop exit
PB: predicated region body
PF: predicated region fallthrough
CT: control target
= control target key end

     0   :  { %8 = vsyncpa [#allocation3], 0  ;;  %s858_s0 = inlined_call_operand.hbm [shape: f32[2,16,16], index: 0, kind: input, shape index: {}]   ;;  %s859_s1 = inlined_call_operand.hbm [shape: f32[2,16,16], index: 1, kind: output, shape index: {0}]   ;;  %s860_s2 = inlined_call_operand.hbm [shape: f32[2,16,16], index: 2, kind: output, shape index: {1}]  }
   0x1   :  { %10 = vsyncpa [#allocation3 + $0x1], 0 }
   0x2   :  { %11 = vsyncpa [#allocation4], 0 }
   0x3   :  { %13 = vsyncpa [#allocation4 + $0x1], 0 }
   0x4   :  { %14 = vsyncpa [#allocation7], 0 }
   0x5   :  { %16 = vsyncpa [#allocation7 + $0x1], 0  ;;  %s642_s9 = smov 0   ;;  %s644_s10 = smov 0  }
   0x6   :  { %s646_s11 = smov 0   ;;  %s648_s12 = smov 0  }
   0x7 LB: > { %s663_s13 = sadd.s32 4294967295, %s615_s12   ;;  %s408_s14 = sadd.s32 4294967294, %s615_s12   ;;  %s615_s12 = sphi %s648_s12, %s873_s12   ;;  %s611_s11 = sphi %s646_s11, %s872_s11   ;;  %s607_s10 = sphi %s644_s10, %s871_s10   ;;  %s603_s9 = sphi %s642_s9, %s870_s9  }
   0x8   : > { %s667_s15 = sadd.s32 1, %s615_s12   ;;  %s29_s16 = sadd.s32 1, %s611_s11 }
   0x9   : > { %s26_s17 = ssub.s32 %s615_s12, %s667_s15  ;;  %p36_p0 = scmp.ne.s32.totalorder %s611_s11, %s607_s10 }
   0xa   : > { %p27_p1 = scmp.eq.s32.totalorder %s26_s17, 0  ;;  %p37_p2 = scmp.eq.s32.totalorder %s615_s12, 0 }
   0xb   : > { %p42_p3 = scmp.ne.s32.totalorder %s607_s10, %s603_s9  ;;  %p43_p4 = scmp.eq.s32.totalorder %s663_s13, 0 }
   0xc   : > { %s679_s18 = scalar_select %p27_p1, %s611_s11, %s29_s16  }
   0xd   : > { %p681_p5 = por %p37_p2, %p36_p0  ;;  %p685_p6 = por %p43_p4, %p42_p3 }
   0xe   : > { %p66_p7 = scmp.eq.s32.totalorder %s663_s13, 1  ;;  %p72_p8 = scmp.eq.s32.totalorder %s408_s14, 1 }
   0xf   : > { %p446_p10 = scmp.lt.s32.totalorder %s615_s12, 2  ;;  %s118_s23 = sand.u32 1, %s611_s11  }
  0x10   : > { %p692_p11 = por %p66_p7, %p36_p0  ;;  %p696_p12 = por %p72_p8, %p42_p3 }
  0x11   : > { %s426_s24 = sshll.u32 %s615_s12, 8  ;;  %s411_s25 = sshll.u32 %s118_s23, 4 }
  0x12   : > { %s864_s21 = scalar_select %p692_p11, 1, 0 }
  0x13   : > { %s865_s22 = scalar_select %p696_p12, 1, 0 }
  0x14   : > { %s705_s28 = scalar_lea.hbm %s858_s0, %s426_s24  ;;  %s122_s29 = scalar_lea.vmem [#allocation2], %s411_s25 }
  0x15   : > { %s129_s30 = sshll.u32 %s122_s29, 4  ;;  %p709_p13 = pnand %p446_p10, %p681_p5  ;;  %s713_s30 = int_to_ptr.vmem [resolvable:$true] %s129_s30 }
  0x16   : > { %s715_s4 = scalar_lea.sflag [#allocation3], %s118_s23  ;;  %s487_s5 = scalar_lea.hbm %s705_s28, 256 }
  0x17   : > { %p488_p0 = scmp.ne.s32.totalorder %s705_s28, %s487_s5  ;;  %p489_p1 = pneg %p709_p13 }
  0x18   : > { %s492_s8 = scalar_lea.hbm %s858_s0, 512  ;;  %p493_p4 = scmp.lt.u32.totalorder %s705_s28, %s858_s0 }
  0x19   : > { %p490_p2 = pnand %p489_p1, %p488_p0  ;;  %p494_p5 = scmp.lt.u32.totalorder %s492_s8, %s487_s5 }
  0x1a   : > { %p496_p8 = scmp.lt.u32.totalorder %s487_s5, %s705_s28 }
  0x1b   : > { %p491_p3 = pneg %p490_p2  ;;  %p495_p7 = por %p494_p5, %p493_p4 }
  0x1d   : > { %p497_p10 = por %p496_p8, %p495_p7 }
  0x1f   : > { %p498_p9 = pnand %p497_p10, %p491_p3 }
  0x21   : > { %501 = shalt.err (!%p498_p9)
}
  0x22   : > { %s502_s17 = scalar_lea.vmem %s713_s30, 256  ;;  %s617_s19 = smov [#allocation2]  }
  0x23   : > { %p503_p0 = scmp.ne.s32.totalorder %s713_s30, %s502_s17  ;;  %s507_s23 = sshll.u32 %s617_s19, 4  ;;  %s508_s23 = int_to_ptr.vmem [resolvable:$false] %s507_s23 }
  0x24   : > { %s509_s24 = scalar_lea.vmem %s508_s23, 512  ;;  %p510_p11 = scmp.lt.s32.totalorder %s713_s30, %s508_s23 }
  0x25   : > { %p505_p2 = pnand %p503_p0, %p489_p1  ;;  %p511_p4 = scmp.lt.s32.totalorder %s509_s24, %s502_s17 }
  0x27   : > { %p506_p12 = pneg %p505_p2  ;;  %p512_p5 = por %p511_p4, %p510_p11 }
  0x29   : > { %p513_p7 = pnand %p512_p5, %p506_p12 }
  0x2b   : > { %516 = shalt.err (!%p513_p7)
}
  0x2c   : > { %s618_s25 = smov 128   ;;  %s619_s26 = smov 8  }
  0x2d   : > { %438 = dma.hbm_to_vmem [thread:$0]  (!%p709_p13), %s705_s28, 256, %s713_s30, %s715_s4, %s618_s25, %s618_s25, %s619_s26  }
  0x2e   : > { %p414_p9 = scmp.ge.s32.totalorder %s615_s12, 1  ;;  %p137_p1 = scmp.lt.s32.totalorder %s615_s12, 3 }
  0x30   : > { %p138_p3 = pnand %p414_p9, %p137_p1 }
  0x31   : > { %s746_s27 = sand.u32 (!%p138_p3), 1, %s607_s10  }
  0x32   : > { %141 = sbr.rel (%p138_p3) target bundleno = 466 (0x1d2), region = 24  ;;  %s749_s29 = sshll.u32 (!%p138_p3), %s746_s27, 4 }
  0x33   : > { %s144_s5 = scalar_lea.sflag (!%p138_p3), [#allocation3], %s746_s27  ;;  %s147_s6 = scalar_lea.vmem (!%p138_p3), [#allocation2], %s749_s29 }
  0x39   : > { %590 = dma.done.wait (%p685_p6), %s144_s5, 256  }
  0x3a   : > { %592 = vsyncadd (%p685_p6), %s144_s5, 4294967040  ;;  %v173_v0 = vld [vmem:[%s147_s6] sm:$0xff]  ;;  %s620_s28 = smov 16   ;;  %v174_v1 = vld [vmem:[%s147_s6 + $0x8] sm:$0xff]  ;;  %vm181_vm0 = vcmask 1047680   ;;  %s621_s30 = smov 127   ;;  %v175_v10 = vlaneseq }
  0x3b   : > { %182 = vrot.lane.b32.xlu0 %v173_v0, %s620_s28  ;;  %s622_s20 = smov 113   ;;  %v215_v14 = vmul.f32 2.0, %v173_v0  ;;  %v216_v16 = vmul.f32 2.0, %v174_v1  ;;  %s427_s3 = sshll.u32 %s663_s13, 8  ;;  %vm259_vm7 = vcmask 130048  }
  0x3c   : > { %v176_v11 = vand.u32 127, %v175_v10  ;;  %v178_v13 = vshrl.u32 %v175_v10, 7  ;;  %s172_s4 = scalar_lea.vmem [#allocation6], %s749_s29  ;;  %s165_s8 = scalar_lea.vmem [#allocation5], %s749_s29 }
  0x3d   : > { %s303_s7 = sshll.u32 %s172_s4, 4  ;;  %s287_s14 = sshll.u32 %s165_s8, 4  ;;  %s777_s7 = int_to_ptr.vmem [resolvable:$true] %s303_s7  ;;  %s784_s14 = int_to_ptr.vmem [resolvable:$true] %s287_s14 }
  0x3e   : > { %vm180_vm1 = vcmp.eq.s32.totalorder %v176_v11, 15  ;;  %vm204_vm2 = vcmp.eq.s32.totalorder %v176_v11, 0  ;;  %v179_v23 = vadd.s32 8, %v178_v13  ;;  %vm221_vm3 = vcmp.eq.s32.totalorder %v178_v13, 0  ;;  %s775_s19 = scalar_lea.hbm %s860_s2, %s427_s3  ;;  %s782_s24 = scalar_lea.hbm %s859_s1, %s427_s3 }
  0x3f   : > { %185 = vrot.lane.b32.xlu0 %v174_v1, %s620_s28  ;;  %vm225_vm4 = vcmp.lt.s32.totalorder %v178_v13, 1  ;;  %vm234_vm6 = vcmp.lt.s32.totalorder %v178_v13, 7  ;;  %s274_s25 = scalar_lea.sflag [#allocation7], %s746_s27  ;;  %s517_s26 = scalar_lea.vmem %s777_s7, 256 }
  0x40   : > { %vm231_vm5 = vcmp.eq.s32.totalorder %v179_v23, 15  ;;  %p518_p6 = scmp.ne.s32.totalorder %s777_s7, %s517_s26  ;;  %p867_p11 = scmp.ne.s32.totalorder %s864_s21, 0 }
  0x41   : > { %s623_s29 = smov [#allocation6]  }
  0x42   : > { %p519_p12 = pnand %p518_p6, %p867_p11  ;;  %s521_s5 = sshll.u32 %s623_s29, 4  ;;  %s522_s5 = int_to_ptr.vmem [resolvable:$false] %s521_s5 }
  0x43   : > { %s523_s6 = scalar_lea.vmem %s522_s5, 512  ;;  %p524_p8 = scmp.lt.s32.totalorder %s777_s7, %s522_s5 }
  0x44   : > { %p520_p13 = pneg %p519_p12  ;;  %p525_p10 = scmp.lt.s32.totalorder %s523_s6, %s517_s26 }
  0x46   : > { %p526_p0 = por %p525_p10, %p524_p8 }
  0x48   : > { %p527_p2 = pnand %p526_p0, %p520_p13 }
  0xad   : > { %v183_v2 = vpop.permute.xlu0 %182 }
  0xae   : > { %v184_v3 = vsel %vm181_vm0, %v183_v2, %v173_v0 }
  0xaf   : > { %188 = vrot.lane.b32.xlu1 %v184_v3, %s620_s28 }
  0xb1   : > { %v186_v4 = vpop.permute.xlu0 %185 }
  0xb2   : > { %v187_v5 = vsel %vm181_vm0, %v186_v4, %v174_v1 }
  0xb3   : > { %190 = vrot.lane.b32.xlu1 %v187_v5, %s620_s28 }
 0x121   : > { %v189_v6 = vpop.permute.xlu1 %188 }
 0x122   : > { %v192_v7 = vsel %vm181_vm0, %v189_v6, %v173_v0 }
 0x123   : > { %196 = vrot.lane.b32.xlu0 %v192_v7, %s621_s30 }
 0x125   : > { %v191_v8 = vpop.permute.xlu1 %190 }
 0x126   : > { %v193_v9 = vsel %vm181_vm0, %v191_v8, %v174_v1 }
 0x127   : > { %205 = vrot.lane.b32.xlu0 %v192_v7, %s622_s20  ;;  %198 = vrot.lane.b32.xlu1 %v193_v9, %s621_s30 }
 0x12b   : > { %207 = vrot.lane.b32.xlu1 %v193_v9, %s622_s20 }
 0x195   : > { %v197_v12 = vpop.permute.xlu0 %196 }
 0x196   : > { %v202_v15 = vsel %vm180_vm1, 0.0, %v197_v12 }
 0x197   : > { %v217_v21 = vadd.f32 %v215_v14, %v202_v15 }
 0x199   : > { %v199_v17 = vpop.permute.xlu1 %198  ;;  %v206_v18 = vpop.permute.xlu0 %205 }
 0x19a   : > { %v203_v19 = vsel %vm180_vm1, 0.0, %v199_v17  ;;  %v211_v20 = vsel %vm204_vm2, 0.0, %v206_v18 }
 0x19b   : > { %v213_v22 = vsub.f32 %v202_v15, %v211_v20  ;;  %v218_v24 = vadd.f32 %v216_v16, %v203_v19  ;;  %v219_v26 = vadd.f32 %v217_v21, %v211_v20 }
 0x19d   : > { %v208_v25 = vpop.permute.xlu1 %207  ;;  %v223_v30 = vrot.slane %v213_v22, 7  ;;  %v232_v31 = vrot.slane %v213_v22, 1  ;;  %v239_v36 = vrot.slane %v219_v26, 7  ;;  %v245_v37 = vrot.slane %v219_v26, 1 }
 0x19e   : > { %v212_v27 = vsel %vm204_vm2, 0.0, %v208_v25  ;;  %v251_v39 = vmul.f32 2.0, %v213_v22 }
 0x19f   : > { %v214_v28 = vsub.f32 %v203_v19, %v212_v27  ;;  %v220_v29 = vadd.f32 %v218_v24, %v212_v27 }
 0x1a1   : > { %v224_v32 = vrot.slane %v214_v28, 7  ;;  %v233_v33 = vrot.slane %v214_v28, 1  ;;  %v240_v34 = vrot.slane %v220_v29, 7  ;;  %v246_v35 = vrot.slane %v220_v29, 1 }
 0x1a2   : > { %v252_v38 = vmul.f32 2.0, %v214_v28 }
 0x1a3   : > { %v226_v40 = vsel %vm225_vm4, %v223_v30, %v224_v32  ;;  %v227_v41 = vsel %vm225_vm4, %v224_v32, %v223_v30  ;;  %v236_v42 = vsel %vm234_vm6, %v233_v33, %v232_v31  ;;  %v241_v45 = vsel %vm225_vm4, %v239_v36, %v240_v34 }
 0x1a4   : > { %v228_v43 = vsel %vm221_vm3, 0.0, %v227_v41  ;;  %v238_v44 = vsel %vm231_vm5, 0.0, %v236_v42  ;;  %v242_v46 = vsel %vm225_vm4, %v240_v34, %v239_v36  ;;  %v247_v48 = vsel %vm234_vm6, %v245_v37, %v246_v35 }
 0x1a5   : > { %v243_v47 = vsel %vm221_vm3, 0.0, %v242_v46  ;;  %v248_v49 = vsel %vm234_vm6, %v246_v35, %v245_v37  ;;  %v253_v50 = vadd.f32 %v251_v39, %v228_v43  ;;  %v235_v51 = vsel %vm234_vm6, %v232_v31, %v233_v33 }
 0x1a6   : > { %v250_v52 = vsel %vm231_vm5, 0.0, %v248_v49  ;;  %v254_v53 = vadd.f32 %v252_v38, %v226_v40  ;;  %v262_v54 = vsub.f32 %v247_v48, %v243_v47 }
 0x1a7   : > { %v255_v55 = vadd.f32 %v253_v50, %v235_v51  ;;  %v263_v56 = vsub.f32 %v250_v52, %v241_v45 }
 0x1a8   : > { %v256_v57 = vadd.f32 %v254_v53, %v238_v44  ;;  %v264_v58 = vand.u32 2147483647, %v262_v54 }
 0x1a9   : > { %v257_v59 = vand.u32 2147483647, %v255_v55  ;;  %v265_v60 = vand.u32 2147483647, %v263_v56 }
 0x1aa   : > { %v258_v61 = vand.u32 2147483647, %v256_v57  ;;  %266 = vst.msk [vmem:[%s172_s4] sm:$0xff] %vm259_vm7, %v264_v58 }
 0x1ab   : > { %260 = vst.msk [vmem:[%s165_s8] sm:$0xff] %vm259_vm7, %v257_v59  ;;  %267 = vst.msk [vmem:[%s172_s4 + $0x8] sm:$0xff] %vm259_vm7, %v265_v60 }
 0x1ac   : > { %261 = vst.msk [vmem:[%s165_s8 + $0x8] sm:$0xff] %vm259_vm7, %v258_v61 }
 0x1ad   : > { %530 = shalt.err (!%p527_p2)
}
 0x1ae   : > { %s531_s28 = scalar_lea.hbm %s775_s19, 256  ;;  %s535_s3 = scalar_lea.hbm %s860_s2, 512 }
 0x1af   : > { %p532_p4 = scmp.ne.s32.totalorder %s775_s19, %s531_s28  ;;  %p536_p9 = scmp.lt.u32.totalorder %s775_s19, %s860_s2 }
 0x1b0   : > { %p537_p1 = scmp.lt.u32.totalorder %s535_s3, %s531_s28  ;;  %p539_p6 = scmp.lt.u32.totalorder %s531_s28, %s775_s19 }
 0x1b1   : > { %p533_p5 = pnand %p532_p4, %p867_p11 }
 0x1b2   : > { %p538_p3 = por %p537_p1, %p536_p9 }
 0x1b3   : > { %p534_p7 = pneg %p533_p5 }
 0x1b4   : > { %p540_p12 = por %p539_p6, %p538_p3 }
 0x1b6   : > { %p541_p13 = pnand %p540_p12, %p534_p7 }
 0x1b8   : > { %544 = shalt.err (!%p541_p13)
}
 0x1b9   : > { %s624_s16 = smov 128   ;;  %s625_s17 = smov 8  }
 0x1ba   : > { %432 = dma.vmem_to_hbm [thread:$0]  (%p867_p11), %s777_s7, 256, %s775_s19, %s274_s25, %s624_s16, %s624_s16, %s625_s17  }
 0x1bb   : > { %s269_s13 = scalar_lea.sflag [#allocation4], %s746_s27  ;;  %s545_s23 = scalar_lea.vmem %s784_s14, 256 }
 0x1bc   : > { %p546_p8 = scmp.ne.s32.totalorder %s784_s14, %s545_s23  ;;  %s626_s26 = smov [#allocation5]  }
 0x1bd   : > { %s549_s29 = sshll.u32 %s626_s26, 4  ;;  %s550_s29 = int_to_ptr.vmem [resolvable:$false] %s549_s29 }
 0x1be   : > { %p547_p10 = pnand %p546_p8, %p867_p11  ;;  %s551_s5 = scalar_lea.vmem %s550_s29, 512 }
 0x1bf   : > { %p552_p2 = scmp.lt.s32.totalorder %s784_s14, %s550_s29  ;;  %p553_p4 = scmp.lt.s32.totalorder %s551_s5, %s545_s23 }
 0x1c0   : > { %p548_p0 = pneg %p547_p10 }
 0x1c1   : > { %p554_p5 = por %p553_p4, %p552_p2 }
 0x1c3   : > { %p555_p7 = pnand %p554_p5, %p548_p0 }
 0x1c5   : > { %558 = shalt.err (!%p555_p7)
}
 0x1c6   : > { %s559_s7 = scalar_lea.hbm %s782_s24, 256  ;;  %s563_s6 = scalar_lea.hbm %s859_s1, 512 }
 0x1c7   : > { %p560_p9 = scmp.ne.s32.totalorder %s782_s24, %s559_s7  ;;  %p564_p6 = scmp.lt.u32.totalorder %s782_s24, %s859_s1 }
 0x1c8   : > { %p565_p12 = scmp.lt.u32.totalorder %s563_s6, %s559_s7  ;;  %p567_p8 = scmp.lt.u32.totalorder %s559_s7, %s782_s24 }
 0x1c9   : > { %p561_p1 = pnand %p560_p9, %p867_p11 }
 0x1ca   : > { %p566_p13 = por %p565_p12, %p564_p6 }
 0x1cb   : > { %p562_p3 = pneg %p561_p1 }
 0x1cc   : > { %p568_p10 = por %p567_p8, %p566_p13 }
 0x1ce   : > { %p569_p0 = pnand %p568_p10, %p562_p3 }
 0x1d0   : > { %572 = shalt.err (!%p569_p0)
}
 0x1d1   : > { %431 = dma.vmem_to_hbm [thread:$0]  (%p867_p11), %s784_s14, 256, %s782_s24, %s269_s13, %s624_s16, %s624_s16, %s625_s17  }
 0x1d2 PF: > { %s318_s20 = sand.u32 1, %s603_s9   ;;  %p868_p2 = scmp.ne.s32.totalorder %s865_s22, 0 }
 0x1d3   : > { %p869_p4 = scmp.ge.s32.totalorder %s615_s12, 2  ;;  %s319_s3 = scalar_lea.sflag [#allocation4], %s318_s20 }
 0x1d5   : > { %p440_p5 = pnand %p869_p4, %p868_p2 }
 0x1d7   : > { %594 = dma.done.wait (!%p440_p5), %s319_s3, 256  }
 0x1d8   : > { %596 = vsyncadd (!%p440_p5), %s319_s3, 4294967040  ;;  %s328_s21 = scalar_lea.sflag [#allocation7], %s318_s20 }
 0x1d9   : > { %598 = dma.done.wait (!%p440_p5), %s328_s21, 256  }
 0x1da   : > { %600 = vsyncadd (!%p440_p5), %s328_s21, 4294967040  ;;  %p19_p11 = scmp.ge.s32.totalorder %s667_s15, 4   ;;  %s870_s9 = smov %s607_s10 }
 0x1db   : > { %s871_s10 = smov %s611_s11  ;;  %s872_s11 = smov %s679_s18 }
 0x1dc   : > { %s873_s12 = smov %s667_s15  ;;  %21 = sbr.rel (!%p19_p11) target bundleno = 7 (0x7), region = 86 }
 0x1e3   :  { %333 = vsyncpa [#allocation3], 1 }
 0x1e4   :  { %335 = vsyncpa [#allocation3 + $0x1], 1 }
 0x1e5   :  { %336 = vsyncpa [#allocation4], 1 }
 0x1e6   :  { %338 = vsyncpa [#allocation4 + $0x1], 1 }
 0x1e7   :  { %339 = vsyncpa [#allocation7], 1 }
 0x1e8   :  { %341 = vsyncpa [#allocation7 + $0x1], 1 }

</bundles_post_ra>
